<compile_context>
chip_gen: v7x
topology: tpu7x:2x2x1
jax: 0.10.0
libtpu: 0.0.40
codegen_flags: <defaults>
</compile_context>

<pallas_src>
import functools

import jax
import jax.numpy as jnp
from jax.experimental import pallas as pl
from jax.experimental.pallas import tpu as pltpu


MXU_DTYPE = jnp.bfloat16            # MXU operand dtype at the HBM/DMA boundary
_VMEM_LIMIT = 48 * 1024 * 1024      # <= ~48 MiB: safe on v7x (64 MiB) and v5e/v6e
_INV_SQRT2 = 0.7071067811865476
N_BRANCH = 7                        # 1 global + 6 detail branches
C_MID = 128                         # per-branch conv output channels


def _round_up(x, m):
    return (x + m - 1) // m * m


def _erf(x):
    # Rational erfc approximation (Numerical Recipes 6.2), |rel err| < 1.2e-7,
    # i.e. effectively exact in f32.  Uses only exp/div/abs/select; exp goes to
    # the otherwise-idle EUP slot.
    a = jnp.abs(x)
    t = 1.0 / (1.0 + 0.5 * a)
    poly = -1.26551223 + t * (1.00002368 + t * (0.37409196 + t * (0.09678418 +
           t * (-0.18628806 + t * (0.27886807 + t * (-1.13520398 + t * (1.48851587 +
           t * (-0.82215223 + t * 0.17087277))))))))
    erfc_a = t * jnp.exp(-a * a + poly)
    return jnp.where(x >= 0.0, 1.0 - erfc_a, erfc_a - 1.0)


def _gelu(x):
    return 0.5 * x * (1.0 + _erf(x * _INV_SQRT2))


# ----------------------- fused branch-conv + fusion kernel -------------------

def _fused_decoder_kernel(x_ref, wbr_ref, bbr_ref, wfu_ref, bfu_ref, o_ref):
    """One (batch, time-tile, branch) grid step.

    x_ref:   [tt, 3*c_in]     im2col'd branch input tile (bf16)
    wbr_ref: [3*c_in, 128]    this branch's k=3 conv weight, taps folded in K (bf16)
    bbr_ref: [1, 128]         branch conv bias (f32)
    wfu_ref: [128, n_pad]     this branch's 128-row slice of the 1x1 fusion weight (bf16)
    bfu_ref: [1, n_pad]       fusion bias (f32)
    o_ref:   [tt, n_pad]      f32 output tile; resident across the branch axis
                              (constant out block index on the "arbitrary" dim)
                              and used directly as the accumulator.
    """
    p = pl.program_id(2)

    # Branch k=3 conv as ONE MXU contraction (K = 3*c_in), f32 accumulation.
    feat = jnp.dot(x_ref[...], wbr_ref[...], preferred_element_type=jnp.float32)
    feat = feat + bbr_ref[...]

    # GELU only on the global branch (p == 0).  Computed unconditionally (cheap
    # VPU/EUP work next to the matmuls) and selected so `feat` stays in vregs —
    # no store->load->store epilogue round-trip.
    feat = jnp.where(p == 0, _gelu(feat), feat)

    # Initialize the resident output tile with the fusion bias on the first
    # branch; it then serves as the f32 accumulator across all 7 branches.
    @pl.when(p == 0)
    def _():
        o_ref[...] = jnp.broadcast_to(bfu_ref[...], o_ref.shape)

    # 1x1 fusion conv contribution of this branch's 128-channel slice of K=896.
    o_ref[...] += jnp.dot(feat.astype(MXU_DTYPE), wfu_ref[...],
                          preferred_element_type=jnp.float32)


# ------------------------------ parameter repack -----------------------------

def prepare_decoder_params(params):
    """One-time repack of PyTorch-layout weights into kernel layouts.

    Hoisted out of the per-call forward (perf review): im2col-folded branch
    weights [7, 3*c_max, 128], per-branch fusion-weight slices [7, 128, n_pad],
    biases in f32, MXU operands cast to bf16 once at the HBM boundary.
    """
    g_w, g_b = params["global_w"], params["global_b"]        # [128,gd,3], [128]
    d_w, d_b = params["detail_w"], params["detail_b"]        # [6,128,dd,3], [6,128]
    f_w, f_b = params["fusion_w"], params["fusion_b"]        # [out,896,1], [out]
    c_mid, g_dim, _ = g_w.shape
    n_det, _, d_dim, _ = d_w.shape
    out_dim = f_w.shape[0]
    c_max = _round_up(max(g_dim, d_dim), 8)
    n_pad = _round_up(out_dim, 128)

    # Branch weights -> im2col layout: w[p, k*c_max + c, o] = conv_w[p][o, c, k]
    wg = jnp.pad(jnp.transpose(g_w, (2, 1, 0)),
                 ((0, 0), (0, c_max - g_dim), (0, 0)))        # [3, c_max, 128]
    wd = jnp.pad(jnp.transpose(d_w, (0, 3, 2, 1)),
                 ((0, 0), (0, 0), (0, c_max - d_dim), (0, 0)))  # [6,3,c_max,128]
    w_br = jnp.concatenate([wg.reshape(1, 3 * c_max, c_mid),
                            wd.reshape(n_det, 3 * c_max, c_mid)], axis=0)
    b_br = jnp.concatenate([g_b[None], d_b], axis=0).reshape(n_det + 1, 1, c_mid)

    # 1x1 fusion weight split into per-branch 128-row slices of the K=896 dim
    # (row order matches the torch.cat channel order: [global, detail0..5]).
    w_fu = jnp.transpose(f_w[:, :, 0]).reshape(n_det + 1, c_mid, out_dim)
    w_fu = jnp.pad(w_fu, ((0, 0), (0, 0), (0, n_pad - out_dim)))
    b_fu = jnp.pad(f_b, (0, n_pad - out_dim)).reshape(1, n_pad)

    return dict(w_br=w_br.astype(MXU_DTYPE),
                b_br=b_br.astype(jnp.float32),
                w_fu=w_fu.astype(MXU_DTYPE),
                b_fu=b_fu.astype(jnp.float32))


# ------------------------------- forward pass --------------------------------

def hierarchical_decoder_forward(global_codes, detail_codes, prep, *,
                                 out_dim, time_tile=256):
    """global_codes: [B, T, global_dim]; detail_codes: [B, T+2, detail_dim, 6].

    The detail convs use kernel=3 with no padding, so their output length is
    T_detail - 2; torch.cat along channels requires that to equal the global
    branch length T (i.e. T_detail = T + 2).
    """
    bsz, t_g, g_dim = global_codes.shape
    _, t_d, d_dim, n_det = detail_codes.shape
    assert n_det == 6
    t_out = t_d - 2
    assert t_out == t_g, "detail time length must be global time length + 2"

    w_br, b_br = prep["w_br"], prep["b_br"]
    w_fu, b_fu = prep["w_fu"], prep["b_fu"]
    c_max = w_br.shape[1] // 3
    n_pad = w_fu.shape[-1]
    kc = 3 * c_max

    # ---- stack the 7 branch inputs [7, B, T+2, c_max] in bf16 (global gets the
    #      conv pad=1; details are already length T+2 for the valid conv)
    g_in = jnp.pad(global_codes, ((0, 0), (1, 1), (0, c_max - g_dim)))
    d_in = jnp.pad(jnp.moveaxis(detail_codes, -1, 0),
                   ((0, 0), (0, 0), (0, 0), (0, c_max - d_dim)))
    x_stacked = jnp.concatenate([g_in[None], d_in], axis=0).astype(MXU_DTYPE)

    # ---- fold the 3 conv taps into the contraction dim (im2col):
    #      x_taps[p, b, t, k*c_max + c] = x_stacked[p, b, t + k, c]
    x_taps = jnp.concatenate([x_stacked[:, :, k:k + t_out, :] for k in range(3)],
                             axis=-1)                       # [7, B, T, 3*c_max]

    # ---- time tiling (no halo needed once taps are folded)
    tt = min(time_tile, _round_up(t_out, 8))
    t_pad = _round_up(t_out, tt)
    if t_pad != t_out:
        x_taps = jnp.pad(x_taps, ((0, 0), (0, 0), (0, t_pad - t_out), (0, 0)))

    grid = (bsz, t_pad // tt, N_BRANCH)
    out = pl.pallas_call(
        _fused_decoder_kernel,
        out_shape=jax.ShapeDtypeStruct((bsz, t_pad, n_pad), jnp.float32),
        grid=grid,
        in_specs=[
            pl.BlockSpec((None, None, tt, kc), lambda b, t, p: (p, b, t, 0)),
            pl.BlockSpec((None, kc, C_MID),    lambda b, t, p: (p, 0, 0)),
            pl.BlockSpec((None, 1, C_MID),     lambda b, t, p: (p, 0, 0)),
            pl.BlockSpec((None, C_MID, n_pad), lambda b, t, p: (p, 0, 0)),
            pl.BlockSpec((1, n_pad),           lambda b, t, p: (0, 0)),
        ],
        out_specs=pl.BlockSpec((None, tt, n_pad), lambda b, t, p: (b, t, 0)),
        compiler_params=pltpu.CompilerParams(
            dimension_semantics=("parallel", "parallel", "arbitrary"),
            vmem_limit_bytes=_VMEM_LIMIT,
        ),
    )(x_taps, w_br, b_br, w_fu, b_fu)

    return out[:, :t_out, :out_dim]          # already [B, T, output_dim]


# ----------------------------- reference & init ------------------------------

def _reference_forward(global_codes, detail_codes, params):
    """Plain-JAX reference mirroring the PyTorch module (f32, HIGHEST precision)."""
    hp = jax.lax.Precision.HIGHEST

    def conv1d(x, w, b, pad):
        xp = jnp.pad(x, ((0, 0), (pad, pad), (0, 0)))
        t_out = xp.shape[1] - 2
        taps = jnp.stack([xp[:, k:k + t_out, :] for k in range(3)], axis=2)
        return jnp.einsum("btkc,ock->bto", taps, w, precision=hp) + b

    feats = [jax.nn.gelu(conv1d(global_codes, params["global_w"],
                                params["global_b"], 1), approximate=False)]
    for i in range(6):
        feats.append(conv1d(detail_codes[..., i], params["detail_w"][i],
                            params["detail_b"][i], 0))
    combined = jnp.concatenate(feats, axis=-1)
    return jnp.einsum("btc,oc->bto", combined, params["fusion_w"][:, :, 0],
                      precision=hp) + params["fusion_b"]


def init_params(key, global_dim, detail_dim, output_dim, channels=128, n_detail=6):
    ks = jax.random.split(key, 6)

    def nrm(k, shape, scale=0.02):
        return scale * jax.random.normal(k, shape, jnp.float32)

    return dict(                                       # PyTorch Conv1d layouts
        global_w=nrm(ks[0], (channels, global_dim, 3)),
        global_b=nrm(ks[1], (channels,), 0.01),
        detail_w=nrm(ks[2], (n_detail, channels, detail_dim, 3)),
        detail_b=nrm(ks[3], (n_detail, channels), 0.01),
        fusion_w=nrm(ks[4], (output_dim, channels * 7, 1)),
        fusion_b=nrm(ks[5], (output_dim,), 0.01),
    )


# ---------------------------------- main --------------------------------------

if __name__ == "__main__":
    GLOBAL_DIM, DETAIL_DIM, OUTPUT_DIM = 32, 24, 128
    B, T = 2, 16                     # detail sequences are T + 2 (valid k=3 conv)

    key = jax.random.PRNGKey(0)
    kp, kg, kd = jax.random.split(key, 3)
    params = init_params(kp, GLOBAL_DIM, DETAIL_DIM, OUTPUT_DIM)
    global_codes = jax.random.normal(kg, (B, T, GLOBAL_DIM), jnp.float32)
    detail_codes = jax.random.normal(kd, (B, T + 2, DETAIL_DIM, 6), jnp.float32)

    prep = prepare_decoder_params(params)       # one-time weight repack

    fwd = jax.jit(hierarchical_decoder_forward, static_argnames=("out_dim",))
    y = fwd(global_codes, detail_codes, prep, out_dim=OUTPUT_DIM)
    jax.block_until_ready(y)

    assert y.shape == (B, T, OUTPUT_DIM)
    assert bool(jnp.all(jnp.isfinite(y)))

    ref = _reference_forward(global_codes, detail_codes, params)
    max_err = float(jnp.max(jnp.abs(y - ref)))
    # bf16 MXU operands with f32 accumulation: expected max abs err ~1e-3 at
    # these weight/activation scales.
    assert max_err < 5e-3, f"mismatch vs reference: max abs err {max_err}"

    print("KERNEL_OK")
</pallas_src>

<mosaic_0001>
module attributes {stable_mosaic.version = 11 : i64} {
  func.func @_fused_decoder_kernel(%arg0: i32, %arg1: i32, %arg2: i32, %arg3: memref<1x1x16x96xbf16, #tpu.memory_space<vmem>>, %arg4: memref<1x96x128xbf16, #tpu.memory_space<vmem>>, %arg5: memref<1x1x128xf32, #tpu.memory_space<vmem>>, %arg6: memref<1x128x128xbf16, #tpu.memory_space<vmem>>, %arg7: memref<1x128xf32, #tpu.memory_space<vmem>>, %arg8: memref<1x16x128xf32, #tpu.memory_space<vmem>>) attributes {dimension_semantics = [#tpu.dimension_semantics<parallel>, #tpu.dimension_semantics<parallel>, #tpu.dimension_semantics<arbitrary>], iteration_bounds = array<i64: 2, 1, 7>, scalar_prefetch = 0 : i64, scratch_operands = 0 : i64, tpu.core_type = #tpu.core_type<tc>, window_params = [{transform_indices = @transform_0, window_bounds = array<i64: 1, 1, 16, 96>}, {transform_indices = @transform_1, window_bounds = array<i64: 1, 96, 128>}, {transform_indices = @transform_2, window_bounds = array<i64: 1, 1, 128>}, {transform_indices = @transform_3, window_bounds = array<i64: 1, 128, 128>}, {pipeline_mode = #tpu.pipeline_mode<synchronous>, transform_indices = @transform_4, window_bounds = array<i64: 1, 128>}, {transform_indices = @transform_5, window_bounds = array<i64: 1, 16, 128>}]} {
    %c0 = arith.constant 0 : index
    %c0_0 = arith.constant 0 : index
    %c0_1 = arith.constant 0 : index
    %c0_2 = arith.constant 0 : index
    %0 = vector.load %arg3[%c0, %c0_0, %c0_1, %c0_2] : memref<1x1x16x96xbf16, #tpu.memory_space<vmem>>, vector<1x1x16x96xbf16>
    %1 = vector.shape_cast %0 : vector<1x1x16x96xbf16> to vector<16x96xbf16>
    %c0_3 = arith.constant 0 : index
    %c0_4 = arith.constant 0 : index
    %c0_5 = arith.constant 0 : index
    %2 = vector.load %arg4[%c0_3, %c0_4, %c0_5] : memref<1x96x128xbf16, #tpu.memory_space<vmem>>, vector<1x96x128xbf16>
    %3 = vector.shape_cast %2 : vector<1x96x128xbf16> to vector<96x128xbf16>
    %cst = arith.constant dense<0.000000e+00> : vector<16x128xf32>
    %4 = tpu.matmul %1, %3, %cst {dimension_numbers = #tpu.dot_dimension_numbers<[1], [0], [0], [1], [0, 0, 1, 1], [], []>} : vector<16x96xbf16>, vector<96x128xbf16>, vector<16x128xf32> -> vector<16x128xf32>
    %c0_6 = arith.constant 0 : index
    %c0_7 = arith.constant 0 : index
    %c0_8 = arith.constant 0 : index
    %5 = vector.load %arg5[%c0_6, %c0_7, %c0_8] : memref<1x1x128xf32, #tpu.memory_space<vmem>>, vector<1x1x128xf32>
    %6 = vector.shape_cast %5 : vector<1x1x128xf32> to vector<1x128xf32>
    %7 = vector.broadcast %6 : vector<1x128xf32> to vector<16x128xf32>
    %8 = arith.addf %4, %7 : vector<16x128xf32>
    %c0_i32 = arith.constant 0 : i32
    %9 = arith.cmpi eq, %arg2, %c0_i32 : i32
    %cst_9 = arith.constant 5.000000e-01 : f32
    %10 = vector.broadcast %cst_9 : f32 to vector<16x128xf32>
    %11 = arith.mulf %10, %8 : vector<16x128xf32>
    %cst_10 = arith.constant 0.707106769 : f32
    %12 = vector.broadcast %cst_10 : f32 to vector<16x128xf32>
    %13 = arith.mulf %8, %12 : vector<16x128xf32>
    %14 = math.absf %13 : vector<16x128xf32>
    %cst_11 = arith.constant 5.000000e-01 : f32
    %15 = vector.broadcast %cst_11 : f32 to vector<16x128xf32>
    %16 = arith.mulf %15, %14 : vector<16x128xf32>
    %cst_12 = arith.constant 1.000000e+00 : f32
    %17 = vector.broadcast %cst_12 : f32 to vector<16x128xf32>
    %18 = arith.addf %17, %16 : vector<16x128xf32>
    %cst_13 = arith.constant 1.000000e+00 : f32
    %19 = vector.broadcast %cst_13 : f32 to vector<16x128xf32>
    %20 = arith.divf %19, %18 : vector<16x128xf32>
    %cst_14 = arith.constant 0.170872763 : f32
    %21 = vector.broadcast %cst_14 : f32 to vector<16x128xf32>
    %22 = arith.mulf %20, %21 : vector<16x128xf32>
    %cst_15 = arith.constant -0.822152256 : f32
    %23 = vector.broadcast %cst_15 : f32 to vector<16x128xf32>
    %24 = arith.addf %23, %22 : vector<16x128xf32>
    %25 = arith.mulf %20, %24 : vector<16x128xf32>
    %cst_16 = arith.constant 1.48851585 : f32
    %26 = vector.broadcast %cst_16 : f32 to vector<16x128xf32>
    %27 = arith.addf %26, %25 : vector<16x128xf32>
    %28 = arith.mulf %20, %27 : vector<16x128xf32>
    %cst_17 = arith.constant -1.13520396 : f32
    %29 = vector.broadcast %cst_17 : f32 to vector<16x128xf32>
    %30 = arith.addf %29, %28 : vector<16x128xf32>
    %31 = arith.mulf %20, %30 : vector<16x128xf32>
    %cst_18 = arith.constant 0.278868079 : f32
    %32 = vector.broadcast %cst_18 : f32 to vector<16x128xf32>
    %33 = arith.addf %32, %31 : vector<16x128xf32>
    %34 = arith.mulf %20, %33 : vector<16x128xf32>
    %cst_19 = arith.constant -0.186288059 : f32
    %35 = vector.broadcast %cst_19 : f32 to vector<16x128xf32>
    %36 = arith.addf %35, %34 : vector<16x128xf32>
    %37 = arith.mulf %20, %36 : vector<16x128xf32>
    %cst_20 = arith.constant 0.0967841818 : f32
    %38 = vector.broadcast %cst_20 : f32 to vector<16x128xf32>
    %39 = arith.addf %38, %37 : vector<16x128xf32>
    %40 = arith.mulf %20, %39 : vector<16x128xf32>
    %cst_21 = arith.constant 0.374091953 : f32
    %41 = vector.broadcast %cst_21 : f32 to vector<16x128xf32>
    %42 = arith.addf %41, %40 : vector<16x128xf32>
    %43 = arith.mulf %20, %42 : vector<16x128xf32>
    %cst_22 = arith.constant 1.00002372 : f32
    %44 = vector.broadcast %cst_22 : f32 to vector<16x128xf32>
    %45 = arith.addf %44, %43 : vector<16x128xf32>
    %46 = arith.mulf %20, %45 : vector<16x128xf32>
    %cst_23 = arith.constant -1.26551223 : f32
    %47 = vector.broadcast %cst_23 : f32 to vector<16x128xf32>
    %48 = arith.addf %47, %46 : vector<16x128xf32>
    %cst_24 = arith.constant 0.000000e+00 : f32
    %49 = vector.broadcast %cst_24 : f32 to vector<16x128xf32>
    %50 = arith.subf %49, %14 : vector<16x128xf32>
    %51 = arith.mulf %50, %14 : vector<16x128xf32>
    %52 = arith.addf %51, %48 : vector<16x128xf32>
    %53 = math.exp %52 : vector<16x128xf32>
    %54 = arith.mulf %20, %53 : vector<16x128xf32>
    %cst_25 = arith.constant 0.000000e+00 : f32
    %55 = vector.broadcast %cst_25 : f32 to vector<16x128xf32>
    %56 = arith.cmpf oge, %13, %55 : vector<16x128xf32>
    %cst_26 = arith.constant 1.000000e+00 : f32
    %57 = vector.broadcast %cst_26 : f32 to vector<16x128xf32>
    %58 = arith.subf %57, %54 : vector<16x128xf32>
    %cst_27 = arith.constant 1.000000e+00 : f32
    %59 = vector.broadcast %cst_27 : f32 to vector<16x128xf32>
    %60 = arith.subf %54, %59 : vector<16x128xf32>
    %61 = arith.select %56, %58, %60 : vector<16x128xi1>, vector<16x128xf32>
    %cst_28 = arith.constant 1.000000e+00 : f32
    %62 = vector.broadcast %cst_28 : f32 to vector<16x128xf32>
    %63 = arith.addf %62, %61 : vector<16x128xf32>
    %64 = arith.mulf %11, %63 : vector<16x128xf32>
    %65 = arith.select %9, %64, %8 : vector<16x128xf32>
    %c0_i32_29 = arith.constant 0 : i32
    %66 = arith.cmpi eq, %arg2, %c0_i32_29 : i32
    %67 = arith.extui %66 : i1 to i32
    %c0_i32_30 = arith.constant 0 : i32
    %68 = arith.cmpi ne, %67, %c0_i32_30 : i32
    scf.if %68 {
      %c0_41 = arith.constant 0 : index
      %c0_42 = arith.constant 0 : index
      %79 = vector.load %arg7[%c0_41, %c0_42] : memref<1x128xf32, #tpu.memory_space<vmem>>, vector<1x128xf32>
      %80 = vector.shape_cast %79 : vector<1x128xf32> to vector<1x128xf32>
      %81 = vector.broadcast %80 : vector<1x128xf32> to vector<16x128xf32>
      %c0_43 = arith.constant 0 : index
      %c0_44 = arith.constant 0 : index
      %c0_45 = arith.constant 0 : index
      %82 = vector.load %arg8[%c0_43, %c0_44, %c0_45] : memref<1x16x128xf32, #tpu.memory_space<vmem>>, vector<1x16x128xf32>
      %83 = vector.shape_cast %82 : vector<1x16x128xf32> to vector<16x128xf32>
      %84 = vector.shape_cast %81 : vector<16x128xf32> to vector<1x16x128xf32>
      tpu.vector_store %arg8[%c0_43, %c0_44, %c0_45], %84 {strides = array<i32>} : memref<1x16x128xf32, #tpu.memory_space<vmem>>, vector<1x16x128xf32>,
    } else {
    }
    %c0_31 = arith.constant 0 : index
    %c0_32 = arith.constant 0 : index
    %c0_33 = arith.constant 0 : index
    %69 = vector.load %arg8[%c0_31, %c0_32, %c0_33] : memref<1x16x128xf32, #tpu.memory_space<vmem>>, vector<1x16x128xf32>
    %70 = vector.shape_cast %69 : vector<1x16x128xf32> to vector<16x128xf32>
    %71 = arith.truncf %65 : vector<16x128xf32> to vector<16x128xbf16>
    %c0_34 = arith.constant 0 : index
    %c0_35 = arith.constant 0 : index
    %c0_36 = arith.constant 0 : index
    %72 = vector.load %arg6[%c0_34, %c0_35, %c0_36] : memref<1x128x128xbf16, #tpu.memory_space<vmem>>, vector<1x128x128xbf16>
    %73 = vector.shape_cast %72 : vector<1x128x128xbf16> to vector<128x128xbf16>
    %cst_37 = arith.constant dense<0.000000e+00> : vector<16x128xf32>
    %74 = tpu.matmul %71, %73, %cst_37 {dimension_numbers = #tpu.dot_dimension_numbers<[1], [0], [0], [1], [0, 0, 1, 1], [], []>} : vector<16x128xbf16>, vector<128x128xbf16>, vector<16x128xf32> -> vector<16x128xf32>
    %75 = arith.addf %70, %74 : vector<16x128xf32>
    %c0_38 = arith.constant 0 : index
    %c0_39 = arith.constant 0 : index
    %c0_40 = arith.constant 0 : index
    %76 = vector.load %arg8[%c0_38, %c0_39, %c0_40] : memref<1x16x128xf32, #tpu.memory_space<vmem>>, vector<1x16x128xf32>
    %77 = vector.shape_cast %76 : vector<1x16x128xf32> to vector<16x128xf32>
    %78 = vector.shape_cast %75 : vector<16x128xf32> to vector<1x16x128xf32>
    tpu.vector_store %arg8[%c0_38, %c0_39, %c0_40], %78 {strides = array<i32>} : memref<1x16x128xf32, #tpu.memory_space<vmem>>, vector<1x16x128xf32>,
    return
  }
  func.func @transform_0(%arg0: i32, %arg1: i32, %arg2: i32) -> (i32, i32, i32, i32) {
    %c0_i32 = arith.constant 0 : i32
    %c0_i32_0 = arith.constant 0 : i32
    return %arg2, %arg0, %arg1, %c0_i32 : i32, i32, i32, i32
  }
  func.func @transform_1(%arg0: i32, %arg1: i32, %arg2: i32) -> (i32, i32, i32) {
    %c0_i32 = arith.constant 0 : i32
    %c0_i32_0 = arith.constant 0 : i32
    %c0_i32_1 = arith.constant 0 : i32
    return %arg2, %c0_i32, %c0_i32_0 : i32, i32, i32
  }
  func.func @transform_2(%arg0: i32, %arg1: i32, %arg2: i32) -> (i32, i32, i32) {
    %c0_i32 = arith.constant 0 : i32
    %c0_i32_0 = arith.constant 0 : i32
    %c0_i32_1 = arith.constant 0 : i32
    return %arg2, %c0_i32, %c0_i32_0 : i32, i32, i32
  }
  func.func @transform_3(%arg0: i32, %arg1: i32, %arg2: i32) -> (i32, i32, i32) {
    %c0_i32 = arith.constant 0 : i32
    %c0_i32_0 = arith.constant 0 : i32
    %c0_i32_1 = arith.constant 0 : i32
    return %arg2, %c0_i32, %c0_i32_0 : i32, i32, i32
  }
  func.func @transform_4(%arg0: i32, %arg1: i32, %arg2: i32) -> (i32, i32) {
    %c0_i32 = arith.constant 0 : i32
    %c0_i32_0 = arith.constant 0 : i32
    %c0_i32_1 = arith.constant 0 : i32
    return %c0_i32, %c0_i32_0 : i32, i32
  }
  func.func @transform_5(%arg0: i32, %arg1: i32, %arg2: i32) -> (i32, i32, i32) {
    %c0_i32 = arith.constant 0 : i32
    %c0_i32_0 = arith.constant 0 : i32
    return %arg0, %arg1, %c0_i32 : i32, i32, i32
  }
}

</mosaic_0001>

<bundles_post_ra>
// kernel: hierarchical_decoder_forward.1
= control target key start
LH: loop header
LB: loop body
LE: loop exit
PB: predicated region body
PF: predicated region fallthrough
CT: control target
= control target key end

     0   :  { %10 = vsyncpa [#allocation3], 0  ;;  %s1330_s0 = inlined_call_operand.vmem [shape: bf16[7,2,16,96], index: 0, kind: input, shape index: {}]   ;;  %s1331_s1 = inlined_call_operand.vmem [shape: bf16[7,96,128], index: 1, kind: input, shape index: {}]   ;;  %s1332_s2 = inlined_call_operand.vmem [shape: f32[7,1,128], index: 2, kind: input, shape index: {}]   ;;  %s1333_s3 = inlined_call_operand.vmem [shape: bf16[7,128,128], index: 3, kind: input, shape index: {}]   ;;  %s1334_s4 = inlined_call_operand.vmem [shape: f32[1,128], index: 4, kind: input, shape index: {}]   ;;  %s1335_s5 = inlined_call_operand.hbm [shape: f32[2,16,128], index: 5, kind: output, shape index: {}]  }
   0x1   :  { %12 = vsyncpa [#allocation3 + $0x1], 0  ;;  %s1103_s18 = smov 0   ;;  %s1105_s19 = smov 0  }
   0x2   :  { %s1107_s20 = smov 0   ;;  %s1109_s21 = smov 0  }
   0x3   :  { %s1111_s22 = smov 0   ;;  %s1113_s23 = smov 0  }
   0x4   :  { %s1115_s24 = smov 0   ;;  %s1117_s25 = smov 0  }
   0x5 LB: > { %1341 = sst [smem:[#allocation5_spill]] %s1046_s20  ;;  %s781_s26 = sadd.s32 4294967295, %s1066_s25   ;;  %s1066_s25 = sphi %s1117_s25, %s18_s25   ;;  %s1062_s24 = sphi %s1115_s24, %s1357_s24   ;;  %s1058_s23 = sphi %s1113_s23, %s1356_s23   ;;  %s1054_s22 = sphi %s1111_s22, %s1355_s22   ;;  %s1050_s21 = sphi %s1109_s21, %s1354_s21   ;;  %s1046_s20 = sphi %s1107_s20, %s1353_s20   ;;  %s1042_s19 = sphi %s1105_s19, %s1359_s19   ;;  %s1038_s18 = sphi %s1103_s18, %s1358_s18  }
   0x6   : > { %1342 = sst [smem:[#allocation6_spill]] %s1058_s23  ;;  %s782_s27 = sadd.s32 4294967294, %s1066_s25  }
   0x7   : > { %1343 = sst [smem:[#allocation7_spill]] %s1062_s24  ;;  %s30_s28 = sadd.s32 1, %s1058_s23 }
   0x8   : > { %p31_p0 = scmp.ge.s32.totalorder %s30_s28, 7  ;;  %s37_s29 = sadd.s32 1, %s1062_s24 }
   0x9   : > { %p185_p1 = scmp.ne.s32.totalorder %s1046_s20, %s1042_s19  ;;  %p186_p2 = scmp.eq.s32.totalorder %s781_s26, 13 }
   0xa   : > { %s1361_s28 = smov (%p31_p0, %s30_s28), 0  ;;  %s1363_s29 = smov (!%p31_p0, %s37_s29), %s1062_s24 }
   0xb   : > { %1344 = sst [smem:[#allocation8_spill]] %s1361_s28  ;;  %p1152_p3 = por %p186_p2, %p185_p1 }
   0xc   : > { %p191_p4 = scmp.ne.s32.totalorder %s1042_s19, %s1038_s18  ;;  %p39_p5 = scmp.ge.s32.totalorder %s1363_s29, 2 }
   0xd   : > { %p192_p6 = scmp.eq.s32.totalorder %s782_s27, 13  ;;  %p785_p7 = scmp.ge.s32.totalorder %s1066_s25, 1 }
   0xe   : > { %p252_p8 = scmp.lt.s32.totalorder %s1066_s25, 15  ;;  %s1365_s29 = smov (%p39_p5, %s1363_s29), 0 }
   0xf   : > { %1346 = sst [smem:[#allocation9_spill]] %s1365_s29  ;;  %p1162_p9 = por %p192_p6, %p191_p4 }
  0x10   : > { %p253_p10 = pnand %p785_p7, %p252_p8  ;;  %s170_s7 = ssub.s32 %s1062_s24, %s1365_s29 }
  0x11   : > { %s175_s8 = sadd.s32 1, %s1046_s20  ;;  %p173_p11 = scmp.eq.s32.totalorder %s170_s7, 0  ;;  %v1068_v0 = vmov (!%p253_p10), 0.0   ;;  %vm1069_vm0 = vmmov (!%p253_p10), 0   ;;  %vm392_vm1 = vcmask (!%p253_p10), 785408  }
  0x12   : > { %256 = sbr.rel (%p253_p10) target bundleno = 613 (0x265), region = 40  ;;  %s1336_s10 = sand.u32 (!%p253_p10), 1, %s1042_s19   ;;  %837 = vmatprep.subr.bf16.mxu0 (!%p253_p10), %v1068_v0  ;;  %849 = vmatprep.mubr.msk.bf16.mxu0 (!%p253_p10), %vm1069_vm0, %v1068_v0 }
  0x13   : > { %s1170_s9 = scalar_select %p173_p11, %s1046_s20, %s175_s8  }
  0x14   : > { %p302_p12 = scmp.lt.s32.totalorder (!%p253_p10), %s1050_s21, 6  ;;  %s1176_s11 = sshll.u32 (!%p253_p10), %s1336_s10, 4 }
  0x15   : > { %1348 = sst [smem:[#allocation10_spill]] %s1170_s9  ;;  %p304_p13 = scmp.lt.s32.totalorder (!%p253_p10), %s1054_s22, 1 }
  0x16   : > { %p437_p0 = scmp.eq.s32.totalorder (!%p253_p10), %s1050_s21, 0  ;;  %p804_p1 = scmp.ne.s32.totalorder (!%p253_p10), %s1050_s21, 0 }
  0x19   : > { %s1183_s12 = scalar_select %p302_p12, %s1050_s21, 6 }
  0x1a   : > { %s305_s13 = scalar_select %p304_p13, %s1054_s22, 1 }
  0x1b   : > { %s873_s14 = smul.u32 48, %s1183_s12  ;;  %s819_s15 = sshll.u32 %s1183_s12, 6 }
  0x1c   : > { %s1191_s26 = scalar_lea.vmem %s1333_s3, %s819_s15  ;;  %s787_s27 = sshll.u32 %s305_s13, 1 }
  0x1d   : > { %s319_s10 = scalar_lea.vmem %s1331_s1, %s873_s14  ;;  %s788_s29 = sshll.u32 %s1183_s12, 2 }
  0x1e   : > { %v949_v1 = vld [vmem:[%s319_s10] sm:$0xff]   ;;  %s311_s28 = sadd.s32 %s788_s29, %s787_s27  ;;  %v950_v2 = vld [vmem:[%s319_s10 + $0x8] sm:$0xff]   ;;  %v951_v3 = vld [vmem:[%s319_s10 + $0x10] sm:$0xff]   ;;  %s1237_s29 = scalar_lea.vmem [#allocation2], %s1176_s11 }
  0x1f   : > { %838 = vmatpush3.bf16.msra.mxu0 %v949_v1  ;;  %s789_s24 = sshll.u32 %s311_s28, 2  ;;  %v952_v4 = vld [vmem:[%s319_s10 + $0x18] sm:$0xff]   ;;  %v953_v5 = vld [vmem:[%s319_s10 + $0x20] sm:$0xff]   ;;  %v954_v6 = vld [vmem:[%s319_s10 + $0x28] sm:$0xff]   ;;  %s322_s28 = scalar_lea.vmem %s1332_s2, %s1183_s12 }
  0x20   : > { %839 = vmatprep.subr.bf16.mxu0 %v1068_v0  ;;  %s313_s20 = scalar_lea.vmem %s1330_s0, %s789_s24  ;;  %v793_v8 = vld [vmem:[%s322_s28] ss:$0 sm:$0xff] }
  0x21   : > { %v955_v7 = vld [vmem:[%s313_s20] sm:$0xff]   ;;  %s512_s20 = scalar_select %p437_p0, 1, 0 }
  0x23   : > { %840 = vmatpush3.bf16.msra.mxu0 %v950_v2 }
  0x24   : > { %841 = vmatprep.subr.bf16.mxu0 %v1068_v0 }
  0x27   : > { %842 = vmatpush3.bf16.msra.mxu0 %v951_v3 }
  0x28   : > { %843 = vmatprep.subr.bf16.mxu0 %v1068_v0 }
  0x2b   : > { %844 = vmatpush3.bf16.msra.mxu0 %v952_v4 }
  0x2c   : > { %845 = vmatprep.subr.bf16.mxu0 %v1068_v0 }
  0x2f   : > { %846 = vmatpush3.bf16.msra.mxu0 %v953_v5 }
  0x30   : > { %847 = vmatprep.subr.bf16.mxu0 %v1068_v0 }
  0x33   : > { %848 = vmatpush3.bf16.msra.mxu0 %v954_v6 }
  0x36   : > { %850 = vmatmul.mubr.msk.bf16.vlgmr.msra.gmra.mrb[0].mxu0 %vm392_vm1, %v955_v7 }
 0x109   : > { %v430_v9 = vpop.f32.mrb[0].mxu0 }
 0x10a   : > { %v1209_v10 = vadd.f32 %v793_v8, %v430_v9  ;;  %v851_v11 = vpop.f32.mrb[1].mxu0 }
 0x10b   : > { %v433_v12 = vpop.f32.mrb[2].mxu0 }
 0x10c   : > { %v1212_v13 = vmul.f32 0.70710677, %v1209_v10  ;;  %v1214_v14 = vadd.f32 %v793_v8, %v433_v12  ;;  %v852_v15 = vpop.f32.mrb[3].mxu0 }
 0x10d   : > { %v513_v15 = vstv %s512_s20 }
 0x10e   : > { %v442_v16 = vand.u32 2147483647, %v1212_v13  ;;  %v1218_v17 = vmul.f32 0.70710677, %v1214_v14  ;;  %vm500_vm2 = vcmp.ge.f32.partialorder %v1212_v13, 0.0  ;;  %vm1225_vm4 = vcmp.eq.s32.totalorder %v513_v15, 1 }
 0x110   : > { %v444_v18 = vmul.f32 0.5, %v442_v16  ;;  %v443_v19 = vand.u32 2147483647, %v1218_v17  ;;  %v488_v55 = vsub.f32 0.0, %v442_v16  ;;  %vm501_vm3 = vcmp.ge.f32.partialorder %v1218_v17, 0.0 }
 0x111   : > { %v805_v17 = vld [vmem:[%s1334_s4] ss:$0 sm:$0xff] (!%p804_p1) }
 0x112   : > { %v446_v20 = vadd.f32 1.0, %v444_v18  ;;  %v445_v21 = vmul.f32 0.5, %v443_v19  ;;  %v489_v59 = vsub.f32 0.0, %v443_v19  ;;  %v490_v61 = vmul.f32 %v488_v55, %v442_v16  ;;  %527 = vst [vmem:[%s1237_s29] sm:$0xff] (!%p804_p1), %v805_v17  ;;  %528 = vst [vmem:[%s1237_s29 + $0x8] sm:$0xff] (!%p804_p1), %v805_v17 }
 0x114   : > { %956 = vrcp.f32 %v446_v20  ;;  %v447_v22 = vadd.f32 1.0, %v445_v21  ;;  %v491_v2 = vmul.f32 %v489_v59, %v443_v19  ;;  %v438_v20 = vmul.f32 0.5, %v1209_v10 }
 0x116   : > { %958 = vrcp.f32 %v447_v22 }
 0x11e   : > { %v957_v23 = vpop.eup %956 }
 0x11f   : > { %v452_v24 = vmul.f32 0.17087276, %v957_v23 }
 0x120   : > { %v959_v25 = vpop.eup %958 }
 0x121   : > { %v454_v26 = vadd.f32 -0.82215226, %v452_v24  ;;  %v453_v27 = vmul.f32 0.17087276, %v959_v25 }
 0x123   : > { %v456_v28 = vmul.f32 %v957_v23, %v454_v26  ;;  %v455_v29 = vadd.f32 -0.82215226, %v453_v27 }
 0x125   : > { %v458_v30 = vadd.f32 1.4885159, %v456_v28  ;;  %v457_v31 = vmul.f32 %v959_v25, %v455_v29 }
 0x127   : > { %v460_v32 = vmul.f32 %v957_v23, %v458_v30  ;;  %v459_v33 = vadd.f32 1.4885159, %v457_v31 }
 0x129   : > { %v462_v34 = vadd.f32 -1.135204, %v460_v32  ;;  %v461_v35 = vmul.f32 %v959_v25, %v459_v33 }
 0x12b   : > { %v464_v36 = vmul.f32 %v957_v23, %v462_v34  ;;  %v463_v37 = vadd.f32 -1.135204, %v461_v35 }
 0x12d   : > { %v466_v38 = vadd.f32 0.27886808, %v464_v36  ;;  %v465_v39 = vmul.f32 %v959_v25, %v463_v37 }
 0x12f   : > { %v468_v40 = vmul.f32 %v957_v23, %v466_v38  ;;  %v467_v41 = vadd.f32 0.27886808, %v465_v39 }
 0x131   : > { %v470_v42 = vadd.f32 -0.18628806, %v468_v40  ;;  %v469_v43 = vmul.f32 %v959_v25, %v467_v41 }
 0x133   : > { %v472_v44 = vmul.f32 %v957_v23, %v470_v42  ;;  %v471_v45 = vadd.f32 -0.18628806, %v469_v43 }
 0x135   : > { %v474_v46 = vadd.f32 0.09678418, %v472_v44  ;;  %v473_v47 = vmul.f32 %v959_v25, %v471_v45 }
 0x137   : > { %v476_v48 = vmul.f32 %v957_v23, %v474_v46  ;;  %v475_v49 = vadd.f32 0.09678418, %v473_v47 }
 0x139   : > { %v478_v50 = vadd.f32 0.37409195, %v476_v48  ;;  %v477_v51 = vmul.f32 %v959_v25, %v475_v49 }
 0x13b   : > { %v480_v52 = vmul.f32 %v957_v23, %v478_v50  ;;  %v479_v53 = vadd.f32 0.37409195, %v477_v51 }
 0x13d   : > { %v482_v54 = vadd.f32 1.0000237, %v480_v52  ;;  %v481_v56 = vmul.f32 %v959_v25, %v479_v53 }
 0x13f   : > { %v484_v57 = vmul.f32 %v957_v23, %v482_v54  ;;  %v483_v58 = vadd.f32 1.0000237, %v481_v56 }
 0x141   : > { %v486_v60 = vadd.f32 -1.2655122, %v484_v57  ;;  %v485_v62 = vmul.f32 %v959_v25, %v483_v58 }
 0x143   : > { %v492_v63 = vadd.f32 %v490_v61, %v486_v60  ;;  %v487_v1 = vadd.f32 -1.2655122, %v485_v62 }
 0x145   : > { %v494_v3 = vmul.f32 1.442695, %v492_v63  ;;  %v493_v4 = vadd.f32 %v491_v2, %v487_v1 }
 0x147   : > { %960 = vpow2.f32 %v494_v3  ;;  %v496_v5 = vmul.f32 1.442695, %v493_v4 }
 0x149   : > { %962 = vpow2.f32 %v496_v5 }
 0x151   : > { %v961_v6 = vpop.eup %960 }
 0x152   : > { %v498_v7 = vmul.f32 %v961_v6, %v957_v23 }
 0x153   : > { %v963_v8 = vpop.eup %962 }
 0x154   : > { %v502_v9 = vsub.f32 1.0, %v498_v7  ;;  %v802_v11 = vadd.f32 -1.0, %v498_v7  ;;  %v499_v12 = vmul.f32 %v963_v8, %v959_v25  ;;  %v439_v25 = vmul.f32 0.5, %v1214_v14 }
 0x156   : > { %v506_v16 = vsel %vm500_vm2, %v502_v9, %v802_v11  ;;  %v503_v18 = vsub.f32 1.0, %v499_v12  ;;  %v803_v19 = vadd.f32 -1.0, %v499_v12 }
 0x157   : > { %v508_v21 = vadd.f32 1.0, %v506_v16  ;;  %519 = sbr.rel (%p804_p1) target bundleno = 350 (0x15e), region = 44 }
 0x158   : > { %v507_v23 = vsel %vm501_vm3, %v503_v18, %v803_v19 }
 0x159   : > { %v510_v24 = vmul.f32 %v508_v21, %v438_v20  ;;  %v509_v26 = vadd.f32 1.0, %v507_v23 }
 0x15b   : > { %v515_v13 = vsel %vm1225_vm4, %v510_v24, %v1209_v10  ;;  %v511_v27 = vmul.f32 %v509_v26, %v439_v25 }
 0x15d   : > { %v516_v28 = vsel %vm1225_vm4, %v511_v27, %v1214_v14 }
 0x15e PF: > { %853 = vmatprep.subr.bf16.mxu1 %v1068_v0  ;;  %v964_v10 = vld [vmem:[%s1191_s26] sm:$0xff]   ;;  %869 = vmatprep.mubr.msk.bf16.mxu1 %vm1069_vm0, %v1068_v0  ;;  %v965_v14 = vld [vmem:[%s1191_s26 + $0x8] sm:$0xff]   ;;  %v966_v29 = vld [vmem:[%s1191_s26 + $0x10] sm:$0xff]   ;;  %v531_v35 = vpack.c.bf16 %v516_v28, %v515_v13  ;;  %s820_s21 = sshll.u32 %s1054_s22, 8  ;;  %s657_s11 = sshll.u32 %s1237_s29, 4  ;;  %s1272_s11 = int_to_ptr.vmem [resolvable:$true] %s657_s11 }
 0x15f   : > { %854 = vmatpush3.bf16.msra.mxu1 %v964_v10  ;;  %v967_v30 = vld [vmem:[%s1191_s26 + $0x18] sm:$0xff]   ;;  %v968_v31 = vld [vmem:[%s1191_s26 + $0x20] sm:$0xff]   ;;  %v969_v32 = vld [vmem:[%s1191_s26 + $0x28] sm:$0xff]   ;;  %s1270_s14 = scalar_lea.hbm %s1335_s5, %s820_s21  ;;  %s1351_s22 = sand.u32 1, %s1042_s19  }
 0x160   : > { %855 = vmatprep.subr.bf16.mxu1 %v1068_v0  ;;  %v970_v33 = vld [vmem:[%s1191_s26 + $0x30] sm:$0xff]   ;;  %v971_v34 = vld [vmem:[%s1191_s26 + $0x38] sm:$0xff]   ;;  %s1278_s15 = scalar_lea.sflag [#allocation3], %s1351_s22  ;;  %s972_s16 = scalar_lea.vmem %s1272_s11, 256 }
 0x161   : > { %v529_v36 = vld [vmem:[%s1237_s29] sm:$0xff]  ;;  %v530_v38 = vld [vmem:[%s1237_s29 + $0x8] sm:$0xff]  ;;  %p973_p2 = scmp.ne.s32.totalorder %s1272_s11, %s972_s16  ;;  %s1070_s17 = smov [#allocation2]  }
 0x162   : > { %s976_s26 = sshll.u32 %s1070_s17, 4  ;;  %s977_s26 = int_to_ptr.vmem [resolvable:$false] %s976_s26 }
 0x163   : > { %856 = vmatpush3.bf16.msra.mxu1 %v965_v14  ;;  %p974_p4 = pnand %p973_p2, %p1152_p3  ;;  %s978_s27 = scalar_lea.vmem %s977_s26, 512 }
 0x164   : > { %857 = vmatprep.subr.bf16.mxu1 %v1068_v0  ;;  %p979_p6 = scmp.lt.s32.totalorder %s1272_s11, %s977_s26  ;;  %p980_p7 = scmp.lt.s32.totalorder %s978_s27, %s972_s16 }
 0x165   : > { %p975_p5 = pneg %p974_p4 }
 0x166   : > { %p981_p8 = por %p980_p7, %p979_p6 }
 0x167   : > { %858 = vmatpush3.bf16.msra.mxu1 %v966_v29 }
 0x168   : > { %859 = vmatprep.subr.bf16.mxu1 %v1068_v0  ;;  %p982_p10 = pnand %p981_p8, %p975_p5 }
 0x16b   : > { %860 = vmatpush3.bf16.msra.mxu1 %v967_v30 }
 0x16c   : > { %861 = vmatprep.subr.bf16.mxu1 %v1068_v0 }
 0x16f   : > { %862 = vmatpush3.bf16.msra.mxu1 %v968_v31 }
 0x170   : > { %863 = vmatprep.subr.bf16.mxu1 %v1068_v0 }
 0x173   : > { %864 = vmatpush3.bf16.msra.mxu1 %v969_v32 }
 0x174   : > { %865 = vmatprep.subr.bf16.mxu1 %v1068_v0 }
 0x177   : > { %866 = vmatpush3.bf16.msra.mxu1 %v970_v33 }
 0x178   : > { %867 = vmatprep.subr.bf16.mxu1 %v1068_v0 }
 0x17b   : > { %868 = vmatpush3.bf16.msra.mxu1 %v971_v34 }
 0x17e   : > { %870 = vmatmul.mubr.bf16.vlgmr.msra.gmra.mrb[0].mxu1 %v531_v35 }
 0x251   : > { %v630_v37 = vpop.f32.mrb[0].mxu1 }
 0x252   : > { %v637_v39 = vadd.f32 %v630_v37, %v529_v36  ;;  %v871_v40 = vpop.f32.mrb[1].mxu1 }
 0x253   : > { %v633_v41 = vpop.f32.mrb[2].mxu1 }
 0x254   : > { %639 = vst [vmem:[%s1237_s29] sm:$0xff] %v637_v39  ;;  %v638_v0 = vadd.f32 %v633_v41, %v530_v38  ;;  %v872_v42 = vpop.f32.mrb[3].mxu1 }
 0x256   : > { %640 = vst [vmem:[%s1237_s29 + $0x8] sm:$0xff] %v638_v0 }
 0x257   : > { %985 = shalt.err (!%p982_p10)
}
 0x258   : > { %s986_s7 = scalar_lea.hbm %s1270_s14, 256  ;;  %s990_s24 = scalar_lea.hbm %s1335_s5, 512 }
 0x259   : > { %p987_p11 = scmp.ne.s32.totalorder %s1270_s14, %s986_s7  ;;  %p991_p0 = scmp.lt.u32.totalorder %s1270_s14, %s1335_s5 }
 0x25a   : > { %p992_p1 = scmp.lt.u32.totalorder %s990_s24, %s986_s7  ;;  %p994_p4 = scmp.lt.u32.totalorder %s986_s7, %s1270_s14 }
 0x25b   : > { %p988_p12 = pnand %p987_p11, %p1152_p3 }
 0x25c   : > { %p993_p2 = por %p992_p1, %p991_p0 }
 0x25d   : > { %p989_p13 = pneg %p988_p12 }
 0x25e   : > { %p995_p5 = por %p994_p4, %p993_p2 }
 0x260   : > { %p996_p6 = pnand %p995_p5, %p989_p13 }
 0x262   : > { %999 = shalt.err (!%p996_p6)
}
 0x263   : > { %s1071_s29 = smov 128   ;;  %s1072_s9 = smov 8  }
 0x264   : > { %874 = dma.vmem_to_hbm [thread:$0]  (%p1152_p3), %s1272_s11, 256, %s1270_s14, %s1278_s15, %s1071_s29, %s1071_s29, %s1072_s9  }
 0x265 PF: > { %p880_p7 = scmp.ge.s32.totalorder %s1066_s25, 2  ;;  %s672_s10 = sand.u32 1, %s1038_s18  }
 0x266   : > { %s673_s21 = scalar_lea.sflag [#allocation3], %s672_s10 }
 0x267   : > { %p877_p8 = pnand %p880_p7, %p1162_p9 }
 0x269   : > { %1033 = dma.done.wait (!%p877_p8), %s673_s21, 256  }
 0x26a   : > { %1035 = vsyncadd (!%p877_p8), %s673_s21, 4294967040  ;;  %s18_s25 = sadd.s32 1, %s1066_s25   ;;  %s1352_s12 = sld [smem:[#allocation5_spill]] }
 0x26b   : > { %p15_p10 = scmp.ge.s32.totalorder %s18_s25, 16   ;;  %s1353_s20 = sld [smem:[#allocation10_spill]] }
 0x26c   : > { %s1354_s21 = sld [smem:[#allocation6_spill]]  ;;  %s1355_s22 = sld [smem:[#allocation7_spill]] }
 0x26d   : > { %s1356_s23 = sld [smem:[#allocation8_spill]]  ;;  %s1357_s24 = sld [smem:[#allocation9_spill]] }
 0x26e   : > { %s1358_s18 = smov %s1042_s19  ;;  %17 = sbr.rel (!%p15_p10) target bundleno = 5 (0x5), region = 88 }
 0x270   : > { %s1359_s19 = smov %s1352_s12 }
 0x275   :  { %678 = vsyncpa [#allocation3], 1 }
 0x276   :  { %680 = vsyncpa [#allocation3 + $0x1], 1 }

</bundles_post_ra>
